<compile_context>
chip_gen: v6e
topology: v6e:2x2x1
jax: 0.10.0
libtpu: 0.0.40
codegen_flags: <defaults>
</compile_context>

<pallas_src>
import functools

import jax
import jax.numpy as jnp
from jax.experimental import pallas as pl
from jax.experimental.pallas import tpu as pltpu


def _round_up(x, m):
    return ((x + m - 1) // m) * m


# --------------------------- fused forward kernel ----------------------------
def _fused_kernel(xp_ref, tok_ref, w_ref, loss_ref, *, B, S, Tm1, H, V):
    """Fused encoder RNN + decoder RNN + fused(proj,out) + CE(sum).

    xp_ref : ((S + T-1)*B, H) f32  precomputed x @ W_ih^T + (b_ih + b_hh),
             time-major (row = t*B + b); encoder rows first, then decoder rows.
    tok_ref: ((T-1)*B, 1) int32    gold tokens target[b, t+1], time-major.
    w_ref  : packed weight slab, pre-padded to (mult-of-8, 128):
             rows [0:H)       enc W_hh^T          (H, H)
             rows [H:2H)      dec W_hh^T          (H, H)
             rows [2H:3H)     W_po = proj^T@out^T (H, V)
             row  [3H]        b_po                (1, V)
    loss_ref: (1, 1) f32 summed cross-entropy.
    """
    # Static slices out of the single packed weight slab (one input DMA).
    whe = w_ref[0:H, 0:H]
    whd = w_ref[H:2 * H, 0:H]
    wpo = w_ref[2 * H:3 * H, 0:V]
    bpo = w_ref[3 * H:3 * H + 1, 0:V]

    xp = xp_ref[...]                     # ((S+Tm1)*B, H)
    tok = tok_ref[...]                   # (Tm1*B, 1)

    # Encoder recurrence -- only the final hidden state is needed.
    h = jnp.zeros((B, H), jnp.float32)
    for t in range(S):                   # tiny trip count, fully unrolled
        h = jnp.tanh(xp[t * B:(t + 1) * B, :]
                     + jnp.dot(h, whe, preferred_element_type=jnp.float32))

    # Decoder recurrence with per-step loss accumulation: hidden states stay
    # register-resident (no VMEM scratch, no masked sub-tile stores).
    lane = jax.lax.broadcasted_iota(jnp.int32, (B, V), 1)   # hoisted, no CSE
    loss_vec = jnp.zeros((B, 1), jnp.float32)
    off = S * B
    for t in range(Tm1):
        h = jnp.tanh(xp[off + t * B: off + (t + 1) * B, :]
                     + jnp.dot(h, whd, preferred_element_type=jnp.float32))
        scores = jnp.dot(h, wpo, preferred_element_type=jnp.float32) + bpo
        m = jnp.max(scores, axis=-1, keepdims=True)
        lse = m + jnp.log(jnp.sum(jnp.exp(scores - m), axis=-1, keepdims=True))
        tok_t = tok[t * B:(t + 1) * B, :]
        picked = jnp.sum(jnp.where(lane == tok_t, scores, 0.0),
                         axis=-1, keepdims=True)
        loss_vec = loss_vec + (lse - picked)

    loss_ref[...] = jnp.sum(loss_vec, keepdims=True)


# --------------------------------- wrapper -----------------------------------
def model_forward(params, source, target):
    f32 = jnp.float32
    emb = params['embedding']                            # (V, E)
    B, S = source.shape
    _, T = target.shape
    H = params['enc_w_hh'].shape[0]
    V = params['out_w'].shape[0]
    Tm1 = T - 1

    # Projected vocab tables: exact rewrite of gather(emb) @ W_ih^T + biases.
    enc_tab = emb @ params['enc_w_ih'].T + (params['enc_b_ih'] + params['enc_b_hh'])
    dec_tab = emb @ params['dec_w_ih'].T + (params['dec_b_ih'] + params['dec_b_hh'])

    # Time-major gathers (row = t*B + b), concatenated into one activation slab.
    enc_xp = jnp.take(enc_tab, jnp.transpose(source).reshape(-1), axis=0)          # (S*B, H)
    dec_xp = jnp.take(dec_tab, jnp.transpose(target[:, :Tm1]).reshape(-1), axis=0)  # (Tm1*B, H)
    xp = jnp.concatenate([enc_xp, dec_xp], axis=0).astype(f32)

    tok = jnp.transpose(target[:, 1:]).reshape(Tm1 * B, 1).astype(jnp.int32)

    # Fuse projection + output Linears offline (no nonlinearity between them).
    w_po = params['proj_w'].T @ params['out_w'].T                      # (H, V)
    b_po = params['proj_b'] @ params['out_w'].T + params['out_b']      # (V,)

    # Pack remaining weights into one pre-padded (mult-of-8 x 128) slab.
    rows = _round_up(3 * H + 1, 8)
    cols = _round_up(max(H, V), 128)
    w_slab = jnp.zeros((rows, cols), f32)
    w_slab = w_slab.at[0:H, 0:H].set(params['enc_w_hh'].T.astype(f32))
    w_slab = w_slab.at[H:2 * H, 0:H].set(params['dec_w_hh'].T.astype(f32))
    w_slab = w_slab.at[2 * H:3 * H, 0:V].set(w_po.astype(f32))
    w_slab = w_slab.at[3 * H, 0:V].set(b_po.astype(f32))

    kernel = functools.partial(_fused_kernel, B=B, S=S, Tm1=Tm1, H=H, V=V)
    loss = pl.pallas_call(
        kernel,
        out_shape=jax.ShapeDtypeStruct((1, 1), f32),
    )(xp, tok, w_slab)
    return loss[0, 0]


# ---------------------------- pure-JAX reference -----------------------------
def _rnn_ref(x, h0, w_ih, w_hh, b_ih, b_hh):
    def step(h, xt):
        h_new = jnp.tanh(xt @ w_ih.T + b_ih + h @ w_hh.T + b_hh)
        return h_new, h_new
    hT, ys = jax.lax.scan(step, h0, jnp.transpose(x, (1, 0, 2)))
    return jnp.transpose(ys, (1, 0, 2)), hT


def reference_forward(params, source, target):
    emb = params['embedding']
    src_emb = emb[source]
    tgt_emb = emb[target]
    B = source.shape[0]
    H = params['enc_w_hh'].shape[0]
    h0 = jnp.zeros((B, H), jnp.float32)
    _, h_enc = _rnn_ref(src_emb, h0, params['enc_w_ih'], params['enc_w_hh'],
                        params['enc_b_ih'], params['enc_b_hh'])
    dec_out, _ = _rnn_ref(tgt_emb, h_enc, params['dec_w_ih'], params['dec_w_hh'],
                          params['dec_b_ih'], params['dec_b_hh'])
    proj = dec_out @ params['proj_w'].T + params['proj_b']
    scores = proj @ params['out_w'].T + params['out_b']
    V = scores.shape[-1]
    scores = scores[:, :-1].reshape(-1, V)
    tgt = target[:, 1:].reshape(-1)
    lse = jax.nn.logsumexp(scores, axis=-1)
    picked = jnp.take_along_axis(scores, tgt[:, None], axis=1)[:, 0]
    return jnp.sum(lse - picked)


if __name__ == "__main__":
    V, E, H = 32, 16, 32          # vocab_size, embed_size, hidden_size
    B, S, T = 2, 8, 8             # batch, source len, target len

    key = jax.random.PRNGKey(0)
    keys = jax.random.split(key, 16)
    u = lambda k, shape: jax.random.uniform(k, shape, jnp.float32, -0.1, 0.1)

    params = {
        'embedding': u(keys[0], (V, E)),
        'enc_w_ih': u(keys[1], (H, E)),
        'enc_w_hh': u(keys[2], (H, H)),
        'enc_b_ih': u(keys[3], (H,)),
        'enc_b_hh': u(keys[4], (H,)),
        'dec_w_ih': u(keys[5], (H, E)),
        'dec_w_hh': u(keys[6], (H, H)),
        'dec_b_ih': u(keys[7], (H,)),
        'dec_b_hh': u(keys[8], (H,)),
        'proj_w': u(keys[9], (H, H)),
        'proj_b': u(keys[10], (H,)),
        'out_w': u(keys[11], (V, H)),
        'out_b': u(keys[12], (V,)),
    }
    source = jax.random.randint(keys[13], (B, S), 0, V, dtype=jnp.int32)
    target = jax.random.randint(keys[14], (B, T), 0, V, dtype=jnp.int32)

    loss = jax.jit(model_forward)(params, source, target)
    jax.block_until_ready(loss)

    ref = reference_forward(params, source, target)
    assert abs(float(loss) - float(ref)) < 1e-2 * max(1.0, abs(float(ref))), (
        float(loss), float(ref))

    print("KERNEL_OK")
</pallas_src>

<mosaic_0001>
module attributes {stable_mosaic.version = 11 : i64} {
  func.func @_fused_kernel(%arg0: memref<30x32xf32, #tpu.memory_space<vmem>>, %arg1: memref<14x1xi32, #tpu.memory_space<vmem>>, %arg2: memref<104x128xf32, #tpu.memory_space<vmem>>, %arg3: memref<1x1xf32, #tpu.memory_space<vmem>>) attributes {dimension_semantics = [], scalar_prefetch = 0 : i64, scratch_operands = 0 : i64, tpu.core_type = #tpu.core_type<tc>} {
    %c0 = arith.constant 0 : index
    %c0_0 = arith.constant 0 : index
    %0 = vector.load %arg2[%c0, %c0_0] : memref<104x128xf32, #tpu.memory_space<vmem>>, vector<32x32xf32>
    %c32 = arith.constant 32 : index
    %c0_1 = arith.constant 0 : index
    %1 = vector.load %arg2[%c32, %c0_1] : memref<104x128xf32, #tpu.memory_space<vmem>>, vector<32x32xf32>
    %c64 = arith.constant 64 : index
    %c0_2 = arith.constant 0 : index
    %2 = vector.load %arg2[%c64, %c0_2] : memref<104x128xf32, #tpu.memory_space<vmem>>, vector<32x32xf32>
    %c96 = arith.constant 96 : index
    %c0_3 = arith.constant 0 : index
    %3 = vector.load %arg2[%c96, %c0_3] : memref<104x128xf32, #tpu.memory_space<vmem>>, vector<1x32xf32>
    %c0_4 = arith.constant 0 : index
    %c0_5 = arith.constant 0 : index
    %4 = vector.load %arg0[%c0_4, %c0_5] : memref<30x32xf32, #tpu.memory_space<vmem>>, vector<30x32xf32>
    %c0_6 = arith.constant 0 : index
    %c0_7 = arith.constant 0 : index
    %5 = vector.load %arg1[%c0_6, %c0_7] : memref<14x1xi32, #tpu.memory_space<vmem>>, vector<14x1xi32>
    %cst = arith.constant 0.000000e+00 : f32
    %6 = vector.broadcast %cst : f32 to vector<2x32xf32>
    %7 = vector.extract_strided_slice %4 {offsets = [0, 0], sizes = [2, 32], strides = [1, 1]} : vector<30x32xf32> to vector<2x32xf32>
    %cst_8 = arith.constant dense<0.000000e+00> : vector<2x32xf32>
    %8 = tpu.matmul %6, %0, %cst_8 {dimension_numbers = #tpu.dot_dimension_numbers<[1], [0], [0], [1], [0, 0, 1, 1], [], []>} : vector<2x32xf32>, vector<32x32xf32>, vector<2x32xf32> -> vector<2x32xf32>
    %9 = arith.addf %7, %8 : vector<2x32xf32>
    %10 = math.tanh %9 : vector<2x32xf32>
    %11 = vector.extract_strided_slice %4 {offsets = [2, 0], sizes = [2, 32], strides = [1, 1]} : vector<30x32xf32> to vector<2x32xf32>
    %cst_9 = arith.constant dense<0.000000e+00> : vector<2x32xf32>
    %12 = tpu.matmul %10, %0, %cst_9 {dimension_numbers = #tpu.dot_dimension_numbers<[1], [0], [0], [1], [0, 0, 1, 1], [], []>} : vector<2x32xf32>, vector<32x32xf32>, vector<2x32xf32> -> vector<2x32xf32>
    %13 = arith.addf %11, %12 : vector<2x32xf32>
    %14 = math.tanh %13 : vector<2x32xf32>
    %15 = vector.extract_strided_slice %4 {offsets = [4, 0], sizes = [2, 32], strides = [1, 1]} : vector<30x32xf32> to vector<2x32xf32>
    %cst_10 = arith.constant dense<0.000000e+00> : vector<2x32xf32>
    %16 = tpu.matmul %14, %0, %cst_10 {dimension_numbers = #tpu.dot_dimension_numbers<[1], [0], [0], [1], [0, 0, 1, 1], [], []>} : vector<2x32xf32>, vector<32x32xf32>, vector<2x32xf32> -> vector<2x32xf32>
    %17 = arith.addf %15, %16 : vector<2x32xf32>
    %18 = math.tanh %17 : vector<2x32xf32>
    %19 = vector.extract_strided_slice %4 {offsets = [6, 0], sizes = [2, 32], strides = [1, 1]} : vector<30x32xf32> to vector<2x32xf32>
    %cst_11 = arith.constant dense<0.000000e+00> : vector<2x32xf32>
    %20 = tpu.matmul %18, %0, %cst_11 {dimension_numbers = #tpu.dot_dimension_numbers<[1], [0], [0], [1], [0, 0, 1, 1], [], []>} : vector<2x32xf32>, vector<32x32xf32>, vector<2x32xf32> -> vector<2x32xf32>
    %21 = arith.addf %19, %20 : vector<2x32xf32>
    %22 = math.tanh %21 : vector<2x32xf32>
    %23 = vector.extract_strided_slice %4 {offsets = [8, 0], sizes = [2, 32], strides = [1, 1]} : vector<30x32xf32> to vector<2x32xf32>
    %cst_12 = arith.constant dense<0.000000e+00> : vector<2x32xf32>
    %24 = tpu.matmul %22, %0, %cst_12 {dimension_numbers = #tpu.dot_dimension_numbers<[1], [0], [0], [1], [0, 0, 1, 1], [], []>} : vector<2x32xf32>, vector<32x32xf32>, vector<2x32xf32> -> vector<2x32xf32>
    %25 = arith.addf %23, %24 : vector<2x32xf32>
    %26 = math.tanh %25 : vector<2x32xf32>
    %27 = vector.extract_strided_slice %4 {offsets = [10, 0], sizes = [2, 32], strides = [1, 1]} : vector<30x32xf32> to vector<2x32xf32>
    %cst_13 = arith.constant dense<0.000000e+00> : vector<2x32xf32>
    %28 = tpu.matmul %26, %0, %cst_13 {dimension_numbers = #tpu.dot_dimension_numbers<[1], [0], [0], [1], [0, 0, 1, 1], [], []>} : vector<2x32xf32>, vector<32x32xf32>, vector<2x32xf32> -> vector<2x32xf32>
    %29 = arith.addf %27, %28 : vector<2x32xf32>
    %30 = math.tanh %29 : vector<2x32xf32>
    %31 = vector.extract_strided_slice %4 {offsets = [12, 0], sizes = [2, 32], strides = [1, 1]} : vector<30x32xf32> to vector<2x32xf32>
    %cst_14 = arith.constant dense<0.000000e+00> : vector<2x32xf32>
    %32 = tpu.matmul %30, %0, %cst_14 {dimension_numbers = #tpu.dot_dimension_numbers<[1], [0], [0], [1], [0, 0, 1, 1], [], []>} : vector<2x32xf32>, vector<32x32xf32>, vector<2x32xf32> -> vector<2x32xf32>
    %33 = arith.addf %31, %32 : vector<2x32xf32>
    %34 = math.tanh %33 : vector<2x32xf32>
    %35 = vector.extract_strided_slice %4 {offsets = [14, 0], sizes = [2, 32], strides = [1, 1]} : vector<30x32xf32> to vector<2x32xf32>
    %cst_15 = arith.constant dense<0.000000e+00> : vector<2x32xf32>
    %36 = tpu.matmul %34, %0, %cst_15 {dimension_numbers = #tpu.dot_dimension_numbers<[1], [0], [0], [1], [0, 0, 1, 1], [], []>} : vector<2x32xf32>, vector<32x32xf32>, vector<2x32xf32> -> vector<2x32xf32>
    %37 = arith.addf %35, %36 : vector<2x32xf32>
    %38 = math.tanh %37 : vector<2x32xf32>
    %39 = tpu.iota {dimensions = array<i32: 1>} : vector<2x32xi32>
    %cst_16 = arith.constant 0.000000e+00 : f32
    %40 = vector.broadcast %cst_16 : f32 to vector<2x1xf32>
    %41 = vector.extract_strided_slice %4 {offsets = [16, 0], sizes = [2, 32], strides = [1, 1]} : vector<30x32xf32> to vector<2x32xf32>
    %cst_17 = arith.constant dense<0.000000e+00> : vector<2x32xf32>
    %42 = tpu.matmul %38, %1, %cst_17 {dimension_numbers = #tpu.dot_dimension_numbers<[1], [0], [0], [1], [0, 0, 1, 1], [], []>} : vector<2x32xf32>, vector<32x32xf32>, vector<2x32xf32> -> vector<2x32xf32>
    %43 = arith.addf %41, %42 : vector<2x32xf32>
    %44 = math.tanh %43 : vector<2x32xf32>
    %cst_18 = arith.constant dense<0.000000e+00> : vector<2x32xf32>
    %45 = tpu.matmul %44, %2, %cst_18 {dimension_numbers = #tpu.dot_dimension_numbers<[1], [0], [0], [1], [0, 0, 1, 1], [], []>} : vector<2x32xf32>, vector<32x32xf32>, vector<2x32xf32> -> vector<2x32xf32>
    %46 = vector.broadcast %3 : vector<1x32xf32> to vector<2x32xf32>
    %47 = arith.addf %45, %46 : vector<2x32xf32>
    %cst_19 = arith.constant dense<0xFF800000> : vector<2xf32>
    %48 = vector.multi_reduction <maximumf>, %47, %cst_19 [1] : vector<2x32xf32> to vector<2xf32>
    %49 = vector.shape_cast %48 : vector<2xf32> to vector<2x1xf32>
    %50 = vector.broadcast %49 : vector<2x1xf32> to vector<2x32xf32>
    %51 = arith.subf %47, %50 : vector<2x32xf32>
    %52 = math.exp %51 : vector<2x32xf32>
    %cst_20 = arith.constant dense<0.000000e+00> : vector<2xf32>
    %53 = vector.multi_reduction <add>, %52, %cst_20 [1] : vector<2x32xf32> to vector<2xf32>
    %54 = vector.shape_cast %53 : vector<2xf32> to vector<2x1xf32>
    %55 = math.log %54 : vector<2x1xf32>
    %56 = arith.addf %49, %55 : vector<2x1xf32>
    %57 = vector.extract_strided_slice %5 {offsets = [0, 0], sizes = [2, 1], strides = [1, 1]} : vector<14x1xi32> to vector<2x1xi32>
    %58 = vector.broadcast %57 : vector<2x1xi32> to vector<2x32xi32>
    %59 = arith.cmpi eq, %39, %58 : vector<2x32xi32>
    %cst_21 = arith.constant 0.000000e+00 : f32
    %60 = vector.broadcast %cst_21 : f32 to vector<2x32xf32>
    %61 = arith.select %59, %47, %60 : vector<2x32xi1>, vector<2x32xf32>
    %cst_22 = arith.constant dense<0.000000e+00> : vector<2xf32>
    %62 = vector.multi_reduction <add>, %61, %cst_22 [1] : vector<2x32xf32> to vector<2xf32>
    %63 = vector.shape_cast %62 : vector<2xf32> to vector<2x1xf32>
    %64 = arith.subf %56, %63 : vector<2x1xf32>
    %65 = arith.addf %40, %64 : vector<2x1xf32>
    %66 = vector.extract_strided_slice %4 {offsets = [18, 0], sizes = [2, 32], strides = [1, 1]} : vector<30x32xf32> to vector<2x32xf32>
    %cst_23 = arith.constant dense<0.000000e+00> : vector<2x32xf32>
    %67 = tpu.matmul %44, %1, %cst_23 {dimension_numbers = #tpu.dot_dimension_numbers<[1], [0], [0], [1], [0, 0, 1, 1], [], []>} : vector<2x32xf32>, vector<32x32xf32>, vector<2x32xf32> -> vector<2x32xf32>
    %68 = arith.addf %66, %67 : vector<2x32xf32>
    %69 = math.tanh %68 : vector<2x32xf32>
    %cst_24 = arith.constant dense<0.000000e+00> : vector<2x32xf32>
    %70 = tpu.matmul %69, %2, %cst_24 {dimension_numbers = #tpu.dot_dimension_numbers<[1], [0], [0], [1], [0, 0, 1, 1], [], []>} : vector<2x32xf32>, vector<32x32xf32>, vector<2x32xf32> -> vector<2x32xf32>
    %71 = vector.broadcast %3 : vector<1x32xf32> to vector<2x32xf32>
    %72 = arith.addf %70, %71 : vector<2x32xf32>
    %cst_25 = arith.constant dense<0xFF800000> : vector<2xf32>
    %73 = vector.multi_reduction <maximumf>, %72, %cst_25 [1] : vector<2x32xf32> to vector<2xf32>
    %74 = vector.shape_cast %73 : vector<2xf32> to vector<2x1xf32>
    %75 = vector.broadcast %74 : vector<2x1xf32> to vector<2x32xf32>
    %76 = arith.subf %72, %75 : vector<2x32xf32>
    %77 = math.exp %76 : vector<2x32xf32>
    %cst_26 = arith.constant dense<0.000000e+00> : vector<2xf32>
    %78 = vector.multi_reduction <add>, %77, %cst_26 [1] : vector<2x32xf32> to vector<2xf32>
    %79 = vector.shape_cast %78 : vector<2xf32> to vector<2x1xf32>
    %80 = math.log %79 : vector<2x1xf32>
    %81 = arith.addf %74, %80 : vector<2x1xf32>
    %82 = vector.extract_strided_slice %5 {offsets = [2, 0], sizes = [2, 1], strides = [1, 1]} : vector<14x1xi32> to vector<2x1xi32>
    %83 = vector.broadcast %82 : vector<2x1xi32> to vector<2x32xi32>
    %84 = arith.cmpi eq, %39, %83 : vector<2x32xi32>
    %cst_27 = arith.constant 0.000000e+00 : f32
    %85 = vector.broadcast %cst_27 : f32 to vector<2x32xf32>
    %86 = arith.select %84, %72, %85 : vector<2x32xi1>, vector<2x32xf32>
    %cst_28 = arith.constant dense<0.000000e+00> : vector<2xf32>
    %87 = vector.multi_reduction <add>, %86, %cst_28 [1] : vector<2x32xf32> to vector<2xf32>
    %88 = vector.shape_cast %87 : vector<2xf32> to vector<2x1xf32>
    %89 = arith.subf %81, %88 : vector<2x1xf32>
    %90 = arith.addf %65, %89 : vector<2x1xf32>
    %91 = vector.extract_strided_slice %4 {offsets = [20, 0], sizes = [2, 32], strides = [1, 1]} : vector<30x32xf32> to vector<2x32xf32>
    %cst_29 = arith.constant dense<0.000000e+00> : vector<2x32xf32>
    %92 = tpu.matmul %69, %1, %cst_29 {dimension_numbers = #tpu.dot_dimension_numbers<[1], [0], [0], [1], [0, 0, 1, 1], [], []>} : vector<2x32xf32>, vector<32x32xf32>, vector<2x32xf32> -> vector<2x32xf32>
    %93 = arith.addf %91, %92 : vector<2x32xf32>
    %94 = math.tanh %93 : vector<2x32xf32>
    %cst_30 = arith.constant dense<0.000000e+00> : vector<2x32xf32>
    %95 = tpu.matmul %94, %2, %cst_30 {dimension_numbers = #tpu.dot_dimension_numbers<[1], [0], [0], [1], [0, 0, 1, 1], [], []>} : vector<2x32xf32>, vector<32x32xf32>, vector<2x32xf32> -> vector<2x32xf32>
    %96 = vector.broadcast %3 : vector<1x32xf32> to vector<2x32xf32>
    %97 = arith.addf %95, %96 : vector<2x32xf32>
    %cst_31 = arith.constant dense<0xFF800000> : vector<2xf32>
    %98 = vector.multi_reduction <maximumf>, %97, %cst_31 [1] : vector<2x32xf32> to vector<2xf32>
    %99 = vector.shape_cast %98 : vector<2xf32> to vector<2x1xf32>
    %100 = vector.broadcast %99 : vector<2x1xf32> to vector<2x32xf32>
    %101 = arith.subf %97, %100 : vector<2x32xf32>
    %102 = math.exp %101 : vector<2x32xf32>
    %cst_32 = arith.constant dense<0.000000e+00> : vector<2xf32>
    %103 = vector.multi_reduction <add>, %102, %cst_32 [1] : vector<2x32xf32> to vector<2xf32>
    %104 = vector.shape_cast %103 : vector<2xf32> to vector<2x1xf32>
    %105 = math.log %104 : vector<2x1xf32>
    %106 = arith.addf %99, %105 : vector<2x1xf32>
    %107 = vector.extract_strided_slice %5 {offsets = [4, 0], sizes = [2, 1], strides = [1, 1]} : vector<14x1xi32> to vector<2x1xi32>
    %108 = vector.broadcast %107 : vector<2x1xi32> to vector<2x32xi32>
    %109 = arith.cmpi eq, %39, %108 : vector<2x32xi32>
    %cst_33 = arith.constant 0.000000e+00 : f32
    %110 = vector.broadcast %cst_33 : f32 to vector<2x32xf32>
    %111 = arith.select %109, %97, %110 : vector<2x32xi1>, vector<2x32xf32>
    %cst_34 = arith.constant dense<0.000000e+00> : vector<2xf32>
    %112 = vector.multi_reduction <add>, %111, %cst_34 [1] : vector<2x32xf32> to vector<2xf32>
    %113 = vector.shape_cast %112 : vector<2xf32> to vector<2x1xf32>
    %114 = arith.subf %106, %113 : vector<2x1xf32>
    %115 = arith.addf %90, %114 : vector<2x1xf32>
    %116 = vector.extract_strided_slice %4 {offsets = [22, 0], sizes = [2, 32], strides = [1, 1]} : vector<30x32xf32> to vector<2x32xf32>
    %cst_35 = arith.constant dense<0.000000e+00> : vector<2x32xf32>
    %117 = tpu.matmul %94, %1, %cst_35 {dimension_numbers = #tpu.dot_dimension_numbers<[1], [0], [0], [1], [0, 0, 1, 1], [], []>} : vector<2x32xf32>, vector<32x32xf32>, vector<2x32xf32> -> vector<2x32xf32>
    %118 = arith.addf %116, %117 : vector<2x32xf32>
    %119 = math.tanh %118 : vector<2x32xf32>
    %cst_36 = arith.constant dense<0.000000e+00> : vector<2x32xf32>
    %120 = tpu.matmul %119, %2, %cst_36 {dimension_numbers = #tpu.dot_dimension_numbers<[1], [0], [0], [1], [0, 0, 1, 1], [], []>} : vector<2x32xf32>, vector<32x32xf32>, vector<2x32xf32> -> vector<2x32xf32>
    %121 = vector.broadcast %3 : vector<1x32xf32> to vector<2x32xf32>
    %122 = arith.addf %120, %121 : vector<2x32xf32>
    %cst_37 = arith.constant dense<0xFF800000> : vector<2xf32>
    %123 = vector.multi_reduction <maximumf>, %122, %cst_37 [1] : vector<2x32xf32> to vector<2xf32>
    %124 = vector.shape_cast %123 : vector<2xf32> to vector<2x1xf32>
    %125 = vector.broadcast %124 : vector<2x1xf32> to vector<2x32xf32>
    %126 = arith.subf %122, %125 : vector<2x32xf32>
    %127 = math.exp %126 : vector<2x32xf32>
    %cst_38 = arith.constant dense<0.000000e+00> : vector<2xf32>
    %128 = vector.multi_reduction <add>, %127, %cst_38 [1] : vector<2x32xf32> to vector<2xf32>
    %129 = vector.shape_cast %128 : vector<2xf32> to vector<2x1xf32>
    %130 = math.log %129 : vector<2x1xf32>
    %131 = arith.addf %124, %130 : vector<2x1xf32>
    %132 = vector.extract_strided_slice %5 {offsets = [6, 0], sizes = [2, 1], strides = [1, 1]} : vector<14x1xi32> to vector<2x1xi32>
    %133 = vector.broadcast %132 : vector<2x1xi32> to vector<2x32xi32>
    %134 = arith.cmpi eq, %39, %133 : vector<2x32xi32>
    %cst_39 = arith.constant 0.000000e+00 : f32
    %135 = vector.broadcast %cst_39 : f32 to vector<2x32xf32>
    %136 = arith.select %134, %122, %135 : vector<2x32xi1>, vector<2x32xf32>
    %cst_40 = arith.constant dense<0.000000e+00> : vector<2xf32>
    %137 = vector.multi_reduction <add>, %136, %cst_40 [1] : vector<2x32xf32> to vector<2xf32>
    %138 = vector.shape_cast %137 : vector<2xf32> to vector<2x1xf32>
    %139 = arith.subf %131, %138 : vector<2x1xf32>
    %140 = arith.addf %115, %139 : vector<2x1xf32>
    %141 = vector.extract_strided_slice %4 {offsets = [24, 0], sizes = [2, 32], strides = [1, 1]} : vector<30x32xf32> to vector<2x32xf32>
    %cst_41 = arith.constant dense<0.000000e+00> : vector<2x32xf32>
    %142 = tpu.matmul %119, %1, %cst_41 {dimension_numbers = #tpu.dot_dimension_numbers<[1], [0], [0], [1], [0, 0, 1, 1], [], []>} : vector<2x32xf32>, vector<32x32xf32>, vector<2x32xf32> -> vector<2x32xf32>
    %143 = arith.addf %141, %142 : vector<2x32xf32>
    %144 = math.tanh %143 : vector<2x32xf32>
    %cst_42 = arith.constant dense<0.000000e+00> : vector<2x32xf32>
    %145 = tpu.matmul %144, %2, %cst_42 {dimension_numbers = #tpu.dot_dimension_numbers<[1], [0], [0], [1], [0, 0, 1, 1], [], []>} : vector<2x32xf32>, vector<32x32xf32>, vector<2x32xf32> -> vector<2x32xf32>
    %146 = vector.broadcast %3 : vector<1x32xf32> to vector<2x32xf32>
    %147 = arith.addf %145, %146 : vector<2x32xf32>
    %cst_43 = arith.constant dense<0xFF800000> : vector<2xf32>
    %148 = vector.multi_reduction <maximumf>, %147, %cst_43 [1] : vector<2x32xf32> to vector<2xf32>
    %149 = vector.shape_cast %148 : vector<2xf32> to vector<2x1xf32>
    %150 = vector.broadcast %149 : vector<2x1xf32> to vector<2x32xf32>
    %151 = arith.subf %147, %150 : vector<2x32xf32>
    %152 = math.exp %151 : vector<2x32xf32>
    %cst_44 = arith.constant dense<0.000000e+00> : vector<2xf32>
    %153 = vector.multi_reduction <add>, %152, %cst_44 [1] : vector<2x32xf32> to vector<2xf32>
    %154 = vector.shape_cast %153 : vector<2xf32> to vector<2x1xf32>
    %155 = math.log %154 : vector<2x1xf32>
    %156 = arith.addf %149, %155 : vector<2x1xf32>
    %157 = vector.extract_strided_slice %5 {offsets = [8, 0], sizes = [2, 1], strides = [1, 1]} : vector<14x1xi32> to vector<2x1xi32>
    %158 = vector.broadcast %157 : vector<2x1xi32> to vector<2x32xi32>
    %159 = arith.cmpi eq, %39, %158 : vector<2x32xi32>
    %cst_45 = arith.constant 0.000000e+00 : f32
    %160 = vector.broadcast %cst_45 : f32 to vector<2x32xf32>
    %161 = arith.select %159, %147, %160 : vector<2x32xi1>, vector<2x32xf32>
    %cst_46 = arith.constant dense<0.000000e+00> : vector<2xf32>
    %162 = vector.multi_reduction <add>, %161, %cst_46 [1] : vector<2x32xf32> to vector<2xf32>
    %163 = vector.shape_cast %162 : vector<2xf32> to vector<2x1xf32>
    %164 = arith.subf %156, %163 : vector<2x1xf32>
    %165 = arith.addf %140, %164 : vector<2x1xf32>
    %166 = vector.extract_strided_slice %4 {offsets = [26, 0], sizes = [2, 32], strides = [1, 1]} : vector<30x32xf32> to vector<2x32xf32>
    %cst_47 = arith.constant dense<0.000000e+00> : vector<2x32xf32>
    %167 = tpu.matmul %144, %1, %cst_47 {dimension_numbers = #tpu.dot_dimension_numbers<[1], [0], [0], [1], [0, 0, 1, 1], [], []>} : vector<2x32xf32>, vector<32x32xf32>, vector<2x32xf32> -> vector<2x32xf32>
    %168 = arith.addf %166, %167 : vector<2x32xf32>
    %169 = math.tanh %168 : vector<2x32xf32>
    %cst_48 = arith.constant dense<0.000000e+00> : vector<2x32xf32>
    %170 = tpu.matmul %169, %2, %cst_48 {dimension_numbers = #tpu.dot_dimension_numbers<[1], [0], [0], [1], [0, 0, 1, 1], [], []>} : vector<2x32xf32>, vector<32x32xf32>, vector<2x32xf32> -> vector<2x32xf32>
    %171 = vector.broadcast %3 : vector<1x32xf32> to vector<2x32xf32>
    %172 = arith.addf %170, %171 : vector<2x32xf32>
    %cst_49 = arith.constant dense<0xFF800000> : vector<2xf32>
    %173 = vector.multi_reduction <maximumf>, %172, %cst_49 [1] : vector<2x32xf32> to vector<2xf32>
    %174 = vector.shape_cast %173 : vector<2xf32> to vector<2x1xf32>
    %175 = vector.broadcast %174 : vector<2x1xf32> to vector<2x32xf32>
    %176 = arith.subf %172, %175 : vector<2x32xf32>
    %177 = math.exp %176 : vector<2x32xf32>
    %cst_50 = arith.constant dense<0.000000e+00> : vector<2xf32>
    %178 = vector.multi_reduction <add>, %177, %cst_50 [1] : vector<2x32xf32> to vector<2xf32>
    %179 = vector.shape_cast %178 : vector<2xf32> to vector<2x1xf32>
    %180 = math.log %179 : vector<2x1xf32>
    %181 = arith.addf %174, %180 : vector<2x1xf32>
    %182 = vector.extract_strided_slice %5 {offsets = [10, 0], sizes = [2, 1], strides = [1, 1]} : vector<14x1xi32> to vector<2x1xi32>
    %183 = vector.broadcast %182 : vector<2x1xi32> to vector<2x32xi32>
    %184 = arith.cmpi eq, %39, %183 : vector<2x32xi32>
    %cst_51 = arith.constant 0.000000e+00 : f32
    %185 = vector.broadcast %cst_51 : f32 to vector<2x32xf32>
    %186 = arith.select %184, %172, %185 : vector<2x32xi1>, vector<2x32xf32>
    %cst_52 = arith.constant dense<0.000000e+00> : vector<2xf32>
    %187 = vector.multi_reduction <add>, %186, %cst_52 [1] : vector<2x32xf32> to vector<2xf32>
    %188 = vector.shape_cast %187 : vector<2xf32> to vector<2x1xf32>
    %189 = arith.subf %181, %188 : vector<2x1xf32>
    %190 = arith.addf %165, %189 : vector<2x1xf32>
    %191 = vector.extract_strided_slice %4 {offsets = [28, 0], sizes = [2, 32], strides = [1, 1]} : vector<30x32xf32> to vector<2x32xf32>
    %cst_53 = arith.constant dense<0.000000e+00> : vector<2x32xf32>
    %192 = tpu.matmul %169, %1, %cst_53 {dimension_numbers = #tpu.dot_dimension_numbers<[1], [0], [0], [1], [0, 0, 1, 1], [], []>} : vector<2x32xf32>, vector<32x32xf32>, vector<2x32xf32> -> vector<2x32xf32>
    %193 = arith.addf %191, %192 : vector<2x32xf32>
    %194 = math.tanh %193 : vector<2x32xf32>
    %cst_54 = arith.constant dense<0.000000e+00> : vector<2x32xf32>
    %195 = tpu.matmul %194, %2, %cst_54 {dimension_numbers = #tpu.dot_dimension_numbers<[1], [0], [0], [1], [0, 0, 1, 1], [], []>} : vector<2x32xf32>, vector<32x32xf32>, vector<2x32xf32> -> vector<2x32xf32>
    %196 = vector.broadcast %3 : vector<1x32xf32> to vector<2x32xf32>
    %197 = arith.addf %195, %196 : vector<2x32xf32>
    %cst_55 = arith.constant dense<0xFF800000> : vector<2xf32>
    %198 = vector.multi_reduction <maximumf>, %197, %cst_55 [1] : vector<2x32xf32> to vector<2xf32>
    %199 = vector.shape_cast %198 : vector<2xf32> to vector<2x1xf32>
    %200 = vector.broadcast %199 : vector<2x1xf32> to vector<2x32xf32>
    %201 = arith.subf %197, %200 : vector<2x32xf32>
    %202 = math.exp %201 : vector<2x32xf32>
    %cst_56 = arith.constant dense<0.000000e+00> : vector<2xf32>
    %203 = vector.multi_reduction <add>, %202, %cst_56 [1] : vector<2x32xf32> to vector<2xf32>
    %204 = vector.shape_cast %203 : vector<2xf32> to vector<2x1xf32>
    %205 = math.log %204 : vector<2x1xf32>
    %206 = arith.addf %199, %205 : vector<2x1xf32>
    %207 = vector.extract_strided_slice %5 {offsets = [12, 0], sizes = [2, 1], strides = [1, 1]} : vector<14x1xi32> to vector<2x1xi32>
    %208 = vector.broadcast %207 : vector<2x1xi32> to vector<2x32xi32>
    %209 = arith.cmpi eq, %39, %208 : vector<2x32xi32>
    %cst_57 = arith.constant 0.000000e+00 : f32
    %210 = vector.broadcast %cst_57 : f32 to vector<2x32xf32>
    %211 = arith.select %209, %197, %210 : vector<2x32xi1>, vector<2x32xf32>
    %cst_58 = arith.constant dense<0.000000e+00> : vector<2xf32>
    %212 = vector.multi_reduction <add>, %211, %cst_58 [1] : vector<2x32xf32> to vector<2xf32>
    %213 = vector.shape_cast %212 : vector<2xf32> to vector<2x1xf32>
    %214 = arith.subf %206, %213 : vector<2x1xf32>
    %215 = arith.addf %190, %214 : vector<2x1xf32>
    %216 = vector.shape_cast %215 : vector<2x1xf32> to vector<1x2x1xf32>
    %cst_59 = arith.constant dense<0.000000e+00> : vector<1xf32>
    %217 = vector.multi_reduction <add>, %216, %cst_59 [1, 2] : vector<1x2x1xf32> to vector<1xf32>
    %218 = vector.shape_cast %217 : vector<1xf32> to vector<1x1x1xf32>
    %219 = vector.extract %218[0, 0, 0] : f32 from vector<1x1x1xf32>
    %220 = vector.broadcast %219 : f32 to vector<1x1xf32>
    %c0_60 = arith.constant 0 : index
    %c0_61 = arith.constant 0 : index
    %221 = vector.load %arg3[%c0_60, %c0_61] : memref<1x1xf32, #tpu.memory_space<vmem>>, vector<1x1xf32>
    tpu.vector_store %arg3[%c0_60, %c0_61], %220 {strides = array<i32>} : memref<1x1xf32, #tpu.memory_space<vmem>>, vector<1x1xf32>,
    return
  }
}

</mosaic_0001>

<bundles_post_ra>
// kernel: model_forward.1
= control target key start
LH: loop header
LB: loop body
LE: loop exit
PB: predicated region body
PF: predicated region fallthrough
CT: control target
= control target key end

     0   :  { %v2361_v1 = vmov 0.0   ;;  %vm2362_vm0 = vmmov 0   ;;  %s2807_s0 = inlined_call_operand.vmem [shape: f32[30,32], index: 0, kind: input, shape index: {}]   ;;  %s2808_s1 = inlined_call_operand.vmem [shape: s32[14,1], index: 1, kind: input, shape index: {}]   ;;  %s2809_s2 = inlined_call_operand.vmem [shape: f32[104,128], index: 2, kind: input, shape index: {}]   ;;  %s2810_s3 = inlined_call_operand.hbm [shape: f32[1,1], index: 3, kind: output, shape index: {}]  }
   0x1   :  { %v2388_v0 = vld [vmem:[%s2809_s2 + $0x18] sm:$0xff]  ;;  %2031 = vmatprep.subr.mxu0 %v2361_v1  ;;  %v2394_v2 = vld [vmem:[%s2809_s2 + $0x10] sm:$0xff]  ;;  %2039 = vmatprep.mubr.msk.f32.mxu0 %vm2362_vm0, %v2361_v1 }
   0x2   :  { %8 = vsyncpa [#allocation3], 0  ;;  %2032 = vmatpush3.msra.mxu0 %v2388_v0  ;;  %2042 = vmatprep.subr.mxu1 %v2361_v1  ;;  %v2404_v3 = vld [vmem:[%s2809_s2 + $0x8] sm:$0xff]  ;;  %v2413_v4 = vld [vmem:[%s2809_s2] sm:$0xff]  ;;  %vm34_vm1 = vcmask 261120   ;;  %vm813_vm2 = vcmask 254976  }
   0x3   :  { %2033 = vmatprep.subr.mxu0 %v2361_v1  ;;  %2043 = vmatpush3.msra.mxu1 %v2388_v0  ;;  %v28_v5 = vld [vmem:[%s2807_s0] sm:$0xff]  ;;  %v29_v28 = vld [vmem:[%s2807_s0 + $0x8] sm:$0xff]  ;;  %v2508_v45 = vld [vmem:[%s2809_s2 + $0x38] sm:$0xff]  ;;  %vm1175_vm4 = vcmask 259076   ;;  %vm1001_vm6 = vcmask 257026   ;;  %vm1349_vm7 = vcmask 261126  }
   0x4   :  { %2034 = vmatpush3.msra.mxu0 %v2394_v2  ;;  %2044 = vmatprep.subr.mxu1 %v2361_v1  ;;  %v2515_v46 = vld [vmem:[%s2809_s2 + $0x30] sm:$0xff]  ;;  %v2522_v47 = vld [vmem:[%s2809_s2 + $0x28] sm:$0xff]  ;;  %v2529_v48 = vld [vmem:[%s2809_s2 + $0x20] sm:$0xff]  ;;  %vm1871_vm8 = vcmask 1024   ;;  %vm1883_vm9 = vcmask 0  }
   0x5   :  { %2035 = vmatprep.subr.mxu0 %v2361_v1  ;;  %2045 = vmatpush3.msra.mxu1 %v2394_v2  ;;  %v2547_v55 = vld [vmem:[%s2809_s2 + $0x58] sm:$0xff]  ;;  %v2552_v56 = vld [vmem:[%s2809_s2 + $0x50] sm:$0xff]  ;;  %v2559_v57 = vld [vmem:[%s2809_s2 + $0x48] sm:$0xff] }
   0x6   :  { %2036 = vmatpush3.msra.mxu0 %v2404_v3  ;;  %2046 = vmatprep.subr.mxu1 %v2361_v1  ;;  %v2566_v58 = vld [vmem:[%s2809_s2 + $0x40] sm:$0xff]  ;;  %v2575_v59 = vld [vmem:[%s2807_s0 + $0x10] sm:$0xff] }
   0x7   :  { %2037 = vmatprep.subr.mxu0 %v2361_v1  ;;  %2047 = vmatpush3.msra.mxu1 %v2404_v3 }
   0x8   :  { %2038 = vmatpush3.msra.mxu0 %v2413_v4  ;;  %2048 = vmatprep.subr.mxu1 %v2361_v1 }
   0x9   :  { %2040 = vmatmul.mubr.f32.vlgmr.msra.gmra.mxu0 %v2361_v1  ;;  %2049 = vmatpush3.msra.mxu1 %v2413_v4 }
   0xa   :  { %2050 = vmatprep.mubr.msk.f32.mxu1 %vm2362_vm0, %v2361_v1  ;;  %2053 = vmatprep.subr.mxu0 %v2361_v1 }
   0xb   :  { %2054 = vmatpush3.msra.mxu0 %v2388_v0  ;;  %2061 = vmatprep.mubr.msk.f32.mxu0 %vm2362_vm0, %v2361_v1 }
   0xc   :  { %2055 = vmatprep.subr.mxu0 %v2361_v1  ;;  %2064 = vmatprep.subr.mxu1 %v2361_v1 }
   0xd   :  { %2056 = vmatpush3.msra.mxu0 %v2394_v2 }
   0xe   :  { %2057 = vmatprep.subr.mxu0 %v2361_v1 }
   0xf   :  { %2058 = vmatpush3.msra.mxu0 %v2404_v3 }
  0x10   :  { %2059 = vmatprep.subr.mxu0 %v2361_v1 }
  0x11   :  { %2060 = vmatpush3.msra.mxu0 %v2413_v4 }
  0x12   :  { %2075 = vmatprep.subr.mxu0 %v2361_v1 }
  0xc9   :  { %v104_v6 = vpop.f32.mrf.mxu0 }
  0xca   :  { %v108_v7 = vadd.f32 %v104_v6, %v28_v5 }
  0xcb   :  { %v2041_v8 = vpop.f32.mrf.mxu0 }
  0xcc   :  { %2281 = vtanh.f32 %v108_v7 }
  0xd9   :  { %v2282_v9 = vpop.eup %2281 }
  0xda   :  { %2051 = vmatmul.mubr.msk.f32.vlgmr.msra.gmra.mxu1 %vm34_vm1, %v2282_v9 }
  0xdb   :  { %2065 = vmatpush3.msra.mxu1 %v2388_v0  ;;  %2072 = vmatprep.mubr.msk.f32.mxu1 %vm2362_vm0, %v2361_v1 }
  0xdc   :  { %2066 = vmatprep.subr.mxu1 %v2361_v1 }
  0xdd   :  { %2067 = vmatpush3.msra.mxu1 %v2394_v2 }
  0xde   :  { %2068 = vmatprep.subr.mxu1 %v2361_v1 }
  0xdf   :  { %2069 = vmatpush3.msra.mxu1 %v2404_v3 }
  0xe0   :  { %2070 = vmatprep.subr.mxu1 %v2361_v1 }
  0xe1   :  { %2071 = vmatpush3.msra.mxu1 %v2413_v4 }
  0xe2   :  { %2086 = vmatprep.subr.mxu1 %v2361_v1 }
 0x19a   :  { %v179_v10 = vpop.f32.mrf.mxu1 }
 0x19b   :  { %v184_v11 = vrot.slane %v179_v10, 6 }
 0x19c   :  { %v2052_v12 = vpop.f32.mrf.mxu1 }
 0x19d   :  { %v186_v13 = vadd.f32 %v184_v11, %v28_v5 }
 0x19f   :  { %2283 = vtanh.f32 %v186_v13 }
 0x1ac   :  { %v2284_v14 = vpop.eup %2283 }
 0x1ad   :  { %v189_v15 = vrot.slane %v2284_v14, 2 }
 0x1af   :  { %2062 = vmatmul.mubr.msk.f32.vlgmr.msra.gmra.mxu0 %vm34_vm1, %v189_v15 }
 0x1b0   :  { %2076 = vmatpush3.msra.mxu0 %v2388_v0  ;;  %2083 = vmatprep.mubr.msk.f32.mxu0 %vm2362_vm0, %v2361_v1 }
 0x1b1   :  { %2077 = vmatprep.subr.mxu0 %v2361_v1 }
 0x1b2   :  { %2078 = vmatpush3.msra.mxu0 %v2394_v2 }
 0x1b3   :  { %2079 = vmatprep.subr.mxu0 %v2361_v1 }
 0x1b4   :  { %2080 = vmatpush3.msra.mxu0 %v2404_v3 }
 0x1b5   :  { %2081 = vmatprep.subr.mxu0 %v2361_v1 }
 0x1b6   :  { %2082 = vmatpush3.msra.mxu0 %v2413_v4 }
 0x1b7   :  { %2097 = vmatprep.subr.mxu0 %v2361_v1 }
 0x26f   :  { %v258_v16 = vpop.f32.mrf.mxu0 }
 0x270   :  { %v263_v17 = vrot.slane %v258_v16, 4 }
 0x271   :  { %v2063_v18 = vpop.f32.mrf.mxu0 }
 0x272   :  { %v265_v19 = vadd.f32 %v263_v17, %v28_v5 }
 0x274   :  { %2285 = vtanh.f32 %v265_v19 }
 0x281   :  { %v2286_v20 = vpop.eup %2285 }
 0x282   :  { %v268_v21 = vrot.slane %v2286_v20, 4 }
 0x284   :  { %2073 = vmatmul.mubr.msk.f32.vlgmr.msra.gmra.mxu1 %vm34_vm1, %v268_v21 }
 0x285   :  { %2087 = vmatpush3.msra.mxu1 %v2388_v0  ;;  %2094 = vmatprep.mubr.msk.f32.mxu1 %vm2362_vm0, %v2361_v1 }
 0x286   :  { %2088 = vmatprep.subr.mxu1 %v2361_v1 }
 0x287   :  { %2089 = vmatpush3.msra.mxu1 %v2394_v2 }
 0x288   :  { %2090 = vmatprep.subr.mxu1 %v2361_v1 }
 0x289   :  { %2091 = vmatpush3.msra.mxu1 %v2404_v3 }
 0x28a   :  { %2092 = vmatprep.subr.mxu1 %v2361_v1 }
 0x28b   :  { %2093 = vmatpush3.msra.mxu1 %v2413_v4 }
 0x28c   :  { %2108 = vmatprep.subr.mxu1 %v2361_v1 }
 0x344   :  { %v337_v22 = vpop.f32.mrf.mxu1 }
 0x345   :  { %v342_v23 = vrot.slane %v337_v22, 2 }
 0x346   :  { %v2074_v24 = vpop.f32.mrf.mxu1 }
 0x347   :  { %v344_v25 = vadd.f32 %v342_v23, %v28_v5 }
 0x349   :  { %2287 = vtanh.f32 %v344_v25 }
 0x356   :  { %v2288_v26 = vpop.eup %2287 }
 0x357   :  { %v347_v27 = vrot.slane %v2288_v26, 6 }
 0x359   :  { %2084 = vmatmul.mubr.msk.f32.vlgmr.msra.gmra.mxu0 %vm34_vm1, %v347_v27 }
 0x35a   :  { %2098 = vmatpush3.msra.mxu0 %v2388_v0  ;;  %2105 = vmatprep.mubr.msk.f32.mxu0 %vm2362_vm0, %v2361_v1 }
 0x35b   :  { %2099 = vmatprep.subr.mxu0 %v2361_v1 }
 0x35c   :  { %2100 = vmatpush3.msra.mxu0 %v2394_v2 }
 0x35d   :  { %2101 = vmatprep.subr.mxu0 %v2361_v1 }
 0x35e   :  { %2102 = vmatpush3.msra.mxu0 %v2404_v3 }
 0x35f   :  { %2103 = vmatprep.subr.mxu0 %v2361_v1 }
 0x360   :  { %2104 = vmatpush3.msra.mxu0 %v2413_v4 }
 0x361   :  { %2119 = vmatprep.subr.mxu0 %v2361_v1 }
 0x419   :  { %v416_v29 = vpop.f32.mrf.mxu0 }
 0x41a   :  { %v420_v30 = vadd.f32 %v416_v29, %v29_v28 }
 0x41b   :  { %v2085_v31 = vpop.f32.mrf.mxu0 }
 0x41c   :  { %2289 = vtanh.f32 %v420_v30 }
 0x429   :  { %v2290_v32 = vpop.eup %2289 }
 0x42a   :  { %2095 = vmatmul.mubr.msk.f32.vlgmr.msra.gmra.mxu1 %vm34_vm1, %v2290_v32  ;;  %v31_v32 = vld [vmem:[%s2807_s0 + $0x18] sm:$0x3f] }
 0x42b   :  { %2109 = vmatpush3.msra.mxu1 %v2388_v0  ;;  %2116 = vmatprep.mubr.msk.f32.mxu1 %vm2362_vm0, %v2361_v1  ;;  %v2603_v0 = vld [vmem:[%s2809_s2 + $0x60] ss:$0 sm:$0xff] }
 0x42c   :  { %2110 = vmatprep.subr.mxu1 %v2361_v1 }
 0x42d   :  { %2111 = vmatpush3.msra.mxu1 %v2394_v2 }
 0x42e   :  { %2112 = vmatprep.subr.mxu1 %v2361_v1 }
 0x42f   :  { %2113 = vmatpush3.msra.mxu1 %v2404_v3 }
 0x430   :  { %2114 = vmatprep.subr.mxu1 %v2361_v1 }
 0x431   :  { %2115 = vmatpush3.msra.mxu1 %v2413_v4 }
 0x432   :  { %2130 = vmatprep.subr.mxu1 %v2361_v1 }
 0x4ea   :  { %v491_v33 = vpop.f32.mrf.mxu1 }
 0x4eb   :  { %v496_v34 = vrot.slane %v491_v33, 6 }
 0x4ec   :  { %v2096_v35 = vpop.f32.mrf.mxu1 }
 0x4ed   :  { %v498_v36 = vadd.f32 %v496_v34, %v29_v28 }
 0x4ef   :  { %2291 = vtanh.f32 %v498_v36 }
 0x4fc   :  { %v2292_v37 = vpop.eup %2291 }
 0x4fd   :  { %v501_v38 = vrot.slane %v2292_v37, 2 }
 0x4ff   :  { %2106 = vmatmul.mubr.msk.f32.vlgmr.msra.gmra.mxu0 %vm34_vm1, %v501_v38 }
 0x500   :  { %2127 = vmatprep.mubr.msk.f32.mxu0 %vm2362_vm0, %v2361_v1  ;;  %2120 = vmatpush3.msra.mxu0 %v2508_v45 }
 0x501   :  { %2121 = vmatprep.subr.mxu0 %v2361_v1 }
 0x502   :  { %2122 = vmatpush3.msra.mxu0 %v2515_v46 }
 0x503   :  { %2123 = vmatprep.subr.mxu0 %v2361_v1 }
 0x504   :  { %2124 = vmatpush3.msra.mxu0 %v2522_v47 }
 0x505   :  { %2125 = vmatprep.subr.mxu0 %v2361_v1 }
 0x506   :  { %2126 = vmatpush3.msra.mxu0 %v2529_v48 }
 0x507   :  { %2141 = vmatprep.subr.mxu0 %v2361_v1 }
 0x5bf   :  { %v570_v39 = vpop.f32.mrf.mxu0 }
 0x5c0   :  { %v575_v40 = vrot.slane %v570_v39, 4 }
 0x5c1   :  { %v2107_v41 = vpop.f32.mrf.mxu0 }
 0x5c2   :  { %v577_v42 = vadd.f32 %v575_v40, %v29_v28 }
 0x5c4   :  { %2293 = vtanh.f32 %v577_v42 }
 0x5d1   :  { %v2294_v43 = vpop.eup %2293 }
 0x5d2   :  { %v580_v44 = vrot.slane %v2294_v43, 4 }
 0x5d4   :  { %2117 = vmatmul.mubr.msk.f32.vlgmr.msra.gmra.mxu1 %vm34_vm1, %v580_v44 }
 0x5d5   :  { %2138 = vmatprep.mubr.msk.f32.mxu1 %vm2362_vm0, %v2361_v1  ;;  %2131 = vmatpush3.msra.mxu1 %v2547_v55 }
 0x5d6   :  { %2132 = vmatprep.subr.mxu1 %v2361_v1 }
 0x5d7   :  { %2133 = vmatpush3.msra.mxu1 %v2552_v56 }
 0x5d8   :  { %2134 = vmatprep.subr.mxu1 %v2361_v1 }
 0x5d9   :  { %2135 = vmatpush3.msra.mxu1 %v2559_v57 }
 0x5da   :  { %2136 = vmatprep.subr.mxu1 %v2361_v1 }
 0x5db   :  { %2137 = vmatpush3.msra.mxu1 %v2566_v58 }
 0x5dc   :  { %2152 = vmatprep.subr.mxu1 %v2361_v1 }
 0x694   :  { %v649_v49 = vpop.f32.mrf.mxu1 }
 0x695   :  { %v654_v50 = vrot.slane %v649_v49, 2 }
 0x696   :  { %v2118_v51 = vpop.f32.mrf.mxu1 }
 0x697   :  { %v656_v52 = vadd.f32 %v654_v50, %v29_v28  ;;  %v2363_v51 = vmov 0  }
 0x698   :  { %2279 = vset.pattern.permute.xlu1 %v2363_v51  ;;  %2280 = vset.pattern.permute.xlu0 %v2363_v51 }
 0x699   :  { %2295 = vtanh.f32 %v656_v52 }
 0x6a6   :  { %v2296_v53 = vpop.eup %2295 }
 0x6a7   :  { %v661_v54 = vrot.slane %v2296_v53, 6 }
 0x6a9   :  { %2128 = vmatmul.mubr.msk.f32.vlgmr.msra.gmra.mxu0 %vm34_vm1, %v661_v54 }
 0x6aa   :  { %2142 = vmatpush3.msra.mxu0 %v2508_v45  ;;  %2149 = vmatprep.mubr.msk.f32.mxu0 %vm2362_vm0, %v2361_v1 }
 0x6ab   :  { %2143 = vmatprep.subr.mxu0 %v2361_v1 }
 0x6ac   :  { %2144 = vmatpush3.msra.mxu0 %v2515_v46 }
 0x6ad   :  { %2145 = vmatprep.subr.mxu0 %v2361_v1 }
 0x6ae   :  { %2146 = vmatpush3.msra.mxu0 %v2522_v47 }
 0x6af   :  { %2147 = vmatprep.subr.mxu0 %v2361_v1 }
 0x6b0   :  { %2148 = vmatpush3.msra.mxu0 %v2529_v48 }
 0x6b1   :  { %2163 = vmatprep.subr.mxu0 %v2361_v1 }
 0x769   :  { %v730_v60 = vpop.f32.mrf.mxu0 }
 0x76a   :  { %v734_v61 = vadd.f32 %v730_v60, %v2575_v59 }
 0x76b   :  { %v2129_v62 = vpop.f32.mrf.mxu0 }
 0x76c   :  { %2297 = vtanh.f32 %v734_v61 }
 0x779   :  { %v2298_v63 = vpop.eup %2297 }
 0x77a   :  { %2139 = vmatmul.mubr.msk.f32.vlgmr.msra.gmra.mxu1 %vm34_vm1, %v2298_v63  ;;  %2150 = vmatmul.mubr.msk.f32.vlgmr.msra.gmra.mxu0 %vm34_vm1, %v2298_v63 }
 0x77b   :  { %2153 = vmatpush3.msra.mxu1 %v2547_v55  ;;  %2164 = vmatpush3.msra.mxu0 %v2508_v45 }
 0x77c   :  { %2154 = vmatprep.subr.mxu1 %v2361_v1  ;;  %2165 = vmatprep.subr.mxu0 %v2361_v1 }
 0x77d   :  { %2155 = vmatpush3.msra.mxu1 %v2552_v56  ;;  %2166 = vmatpush3.msra.mxu0 %v2515_v46 }
 0x77e   :  { %2156 = vmatprep.subr.mxu1 %v2361_v1  ;;  %2167 = vmatprep.subr.mxu0 %v2361_v1 }
 0x77f   :  { %2157 = vmatpush3.msra.mxu1 %v2559_v57  ;;  %2168 = vmatpush3.msra.mxu0 %v2522_v47 }
 0x780   :  { %2158 = vmatprep.subr.mxu1 %v2361_v1  ;;  %2169 = vmatprep.subr.mxu0 %v2361_v1 }
 0x781   :  { %2159 = vmatpush3.msra.mxu1 %v2566_v58  ;;  %2160 = vmatprep.mubr.msk.f32.mxu1 %vm2362_vm0, %v2361_v1 }
 0x782   :  { %2170 = vmatpush3.msra.mxu0 %v2529_v48  ;;  %2171 = vmatprep.mubr.msk.f32.mxu0 %vm2362_vm0, %v2361_v1 }
 0x783   :  { %2174 = vmatprep.subr.mxu1 %v2361_v1  ;;  %2185 = vmatprep.subr.mxu0 %v2361_v1 }
 0x83a   :  { %v809_v2 = vpop.f32.mrf.mxu1  ;;  %v902_v3 = vpop.f32.mrf.mxu0 }
 0x83b   :  { %v2606_v4 = vadd.f32 %v2603_v0, %v809_v2  ;;  %v907_v5 = vrot.slane %v902_v3, 6 }
 0x83c   :  { %v2140_v6 = vpop.f32.mrf.mxu1  ;;  %v2151_v7 = vpop.f32.mrf.mxu0 }
 0x83d   :  { %v909_v8 = vadd.f32 %v907_v5, %v2575_v59  ;;  %v814_v9 = vsel %vm813_vm2, %v2606_v4, -inf }
 0x83e   :  { %815 = vmax.xlane.f32.xlu0 %v814_v9 }
 0x83f   :  { %2299 = vtanh.f32 %v909_v8 }
 0x84c   :  { %v2300_v10 = vpop.eup %2299 }
 0x84d   :  { %v912_v11 = vrot.slane %v2300_v10, 2 }
 0x84f   :  { %2161 = vmatmul.mubr.msk.f32.vlgmr.msra.gmra.mxu1 %vm34_vm1, %v912_v11  ;;  %2172 = vmatmul.mubr.msk.f32.vlgmr.msra.gmra.mxu0 %vm34_vm1, %v912_v11 }
 0x850   :  { %2175 = vmatpush3.msra.mxu1 %v2547_v55  ;;  %2186 = vmatpush3.msra.mxu0 %v2508_v45 }
 0x851   :  { %2176 = vmatprep.subr.mxu1 %v2361_v1  ;;  %2187 = vmatprep.subr.mxu0 %v2361_v1 }
 0x852   :  { %2177 = vmatpush3.msra.mxu1 %v2552_v56  ;;  %2188 = vmatpush3.msra.mxu0 %v2515_v46 }
 0x853   :  { %2178 = vmatprep.subr.mxu1 %v2361_v1  ;;  %2189 = vmatprep.subr.mxu0 %v2361_v1 }
 0x854   :  { %2179 = vmatpush3.msra.mxu1 %v2559_v57  ;;  %2190 = vmatpush3.msra.mxu0 %v2522_v47 }
 0x855   :  { %2180 = vmatprep.subr.mxu1 %v2361_v1  ;;  %2191 = vmatprep.subr.mxu0 %v2361_v1 }
 0x856   :  { %2181 = vmatpush3.msra.mxu1 %v2566_v58  ;;  %2182 = vmatprep.mubr.msk.f32.mxu1 %vm2362_vm0, %v2361_v1 }
 0x857   :  { %2192 = vmatpush3.msra.mxu0 %v2529_v48  ;;  %2193 = vmatprep.mubr.msk.f32.mxu0 %vm2362_vm0, %v2361_v1 }
 0x858   :  { %2196 = vmatprep.subr.mxu1 %v2361_v1  ;;  %2207 = vmatprep.subr.mxu0 %v2361_v1 }
 0x8c7   :  { %v2743_v62 = vpop.xlane.xlu0 %815 }
 0x8c8   :  { %v817_v63 = vsub.f32 %v2606_v4, %v2743_v62 }
 0x8ca   :  { %v818_v3 = vmul.f32 1.442695, %v817_v63 }
 0x90f   :  { %v981_v12 = vpop.f32.mrf.mxu1  ;;  %v1076_v13 = vpop.f32.mrf.mxu0 }
 0x910   :  { %v2634_v14 = vadd.f32 %v2603_v0, %v981_v12  ;;  %v1081_v15 = vrot.slane %v1076_v13, 4 }
 0x911   :  { %v2162_v16 = vpop.f32.mrf.mxu1  ;;  %v2173_v17 = vpop.f32.mrf.mxu0 }
 0x912   :  { %v1083_v18 = vadd.f32 %v1081_v15, %v2575_v59  ;;  %v985_v19 = vsel %vm813_vm2, %v2634_v14, -inf }
 0x913   :  { %986 = vmax.xlane.f32.xlu0 %v985_v19 }
 0x914   :  { %2301 = vtanh.f32 %v1083_v18 }
 0x921   :  { %v2302_v20 = vpop.eup %2301 }
 0x922   :  { %v1086_v21 = vrot.slane %v2302_v20, 4 }
 0x924   :  { %2183 = vmatmul.mubr.msk.f32.vlgmr.msra.gmra.mxu1 %vm34_vm1, %v1086_v21  ;;  %2194 = vmatmul.mubr.msk.f32.vlgmr.msra.gmra.mxu0 %vm34_vm1, %v1086_v21 }
 0x925   :  { %2197 = vmatpush3.msra.mxu1 %v2547_v55  ;;  %2208 = vmatpush3.msra.mxu0 %v2508_v45 }
 0x926   :  { %2198 = vmatprep.subr.mxu1 %v2361_v1  ;;  %2209 = vmatprep.subr.mxu0 %v2361_v1 }
 0x927   :  { %2199 = vmatpush3.msra.mxu1 %v2552_v56  ;;  %2210 = vmatpush3.msra.mxu0 %v2515_v46 }
 0x928   :  { %2200 = vmatprep.subr.mxu1 %v2361_v1  ;;  %2211 = vmatprep.subr.mxu0 %v2361_v1 }
 0x929   :  { %2201 = vmatpush3.msra.mxu1 %v2559_v57  ;;  %2212 = vmatpush3.msra.mxu0 %v2522_v47 }
 0x92a   :  { %2202 = vmatprep.subr.mxu1 %v2361_v1  ;;  %2213 = vmatprep.subr.mxu0 %v2361_v1 }
 0x92b   :  { %2203 = vmatpush3.msra.mxu1 %v2566_v58  ;;  %2204 = vmatprep.mubr.msk.f32.mxu1 %vm2362_vm0, %v2361_v1 }
 0x92c   :  { %2214 = vmatpush3.msra.mxu0 %v2529_v48  ;;  %2215 = vmatprep.mubr.msk.f32.mxu0 %vm2362_vm0, %v2361_v1 }
 0x92d   :  { %2218 = vmatprep.subr.mxu1 %v2361_v1  ;;  %2229 = vmatprep.subr.mxu0 %v2361_v1 }
 0x99c   :  { %v2751_v6 = vpop.xlane.xlu0 %986 }
 0x9e4   :  { %v1155_v22 = vpop.f32.mrf.mxu1  ;;  %v1250_v23 = vpop.f32.mrf.mxu0 }
 0x9e5   :  { %v2662_v24 = vadd.f32 %v2603_v0, %v1155_v22  ;;  %v1255_v25 = vrot.slane %v1250_v23, 2 }
 0x9e6   :  { %v2184_v26 = vpop.f32.mrf.mxu1  ;;  %v2195_v27 = vpop.f32.mrf.mxu0 }
 0x9e7   :  { %v1257_v28 = vadd.f32 %v1255_v25, %v2575_v59  ;;  %v1159_v29 = vsel %vm813_vm2, %v2662_v24, -inf }
 0x9e8   :  { %1160 = vmax.xlane.f32.xlu1 %v1159_v29 }
 0x9e9   :  { %2303 = vtanh.f32 %v1257_v28 }
 0x9f6   :  { %v2304_v30 = vpop.eup %2303 }
 0x9f7   :  { %v1260_v31 = vrot.slane %v2304_v30, 6 }
 0x9f9   :  { %2205 = vmatmul.mubr.msk.f32.vlgmr.msra.gmra.mxu1 %vm34_vm1, %v1260_v31  ;;  %2216 = vmatmul.mubr.msk.f32.vlgmr.msra.gmra.mxu0 %vm34_vm1, %v1260_v31 }
 0x9fa   :  { %2219 = vmatpush3.msra.mxu1 %v2547_v55  ;;  %2230 = vmatpush3.msra.mxu0 %v2508_v45 }
 0x9fb   :  { %2220 = vmatprep.subr.mxu1 %v2361_v1  ;;  %2231 = vmatprep.subr.mxu0 %v2361_v1 }
 0x9fc   :  { %2221 = vmatpush3.msra.mxu1 %v2552_v56  ;;  %2232 = vmatpush3.msra.mxu0 %v2515_v46 }
 0x9fd   :  { %2222 = vmatprep.subr.mxu1 %v2361_v1  ;;  %2233 = vmatprep.subr.mxu0 %v2361_v1 }
 0x9fe   :  { %2223 = vmatpush3.msra.mxu1 %v2559_v57  ;;  %2234 = vmatpush3.msra.mxu0 %v2522_v47 }
 0x9ff   :  { %2224 = vmatprep.subr.mxu1 %v2361_v1  ;;  %2235 = vmatprep.subr.mxu0 %v2361_v1 }
 0xa00   :  { %2225 = vmatpush3.msra.mxu1 %v2566_v58  ;;  %2226 = vmatprep.mubr.msk.f32.mxu1 %vm2362_vm0, %v2361_v1 }
 0xa01   :  { %2236 = vmatpush3.msra.mxu0 %v2529_v48  ;;  %2237 = vmatprep.mubr.msk.f32.mxu0 %vm2362_vm0, %v2361_v1 }
 0xa02   :  { %2240 = vmatprep.subr.mxu1 %v2361_v1  ;;  %2251 = vmatprep.subr.mxu0 %v2361_v1 }
 0xa71   :  { %v2747_v2 = vpop.xlane.xlu1 %1160 }
 0xa72   :  { %v1162_v5 = vsub.f32 %v2662_v24, %v2747_v2 }
 0xa74   :  { %v1163_v8 = vmul.f32 1.442695, %v1162_v5 }
 0xab9   :  { %v1329_v33 = vpop.f32.mrf.mxu1  ;;  %v1424_v34 = vpop.f32.mrf.mxu0 }
 0xaba   :  { %v2693_v35 = vadd.f32 %v2603_v0, %v1329_v33  ;;  %v1428_v36 = vadd.f32 %v1424_v34, %v31_v32  ;;  %v33_v33 = vld [vmem:[%s2808_s1 + $0x8] sm:$0x3f]  ;;  %v988_v34 = vsub.f32 %v2634_v14, %v2751_v6 }
 0xabb   :  { %v2206_v37 = vpop.f32.mrf.mxu1  ;;  %v2217_v38 = vpop.f32.mrf.mxu0 }
 0xabc   :  { %2305 = vtanh.f32 %v1428_v36  ;;  %v1333_v39 = vsel %vm813_vm2, %v2693_v35, -inf  ;;  %v989_v36 = vmul.f32 1.442695, %v988_v34  ;;  %v658_v37 = vlaneseq }
 0xabd   :  { %1334 = vmax.xlane.f32.xlu1 %v1333_v39 }
 0xabe   :  { %v659_v38 = vand.u32 127, %v658_v37 }
 0xac9   :  { %v2306_v40 = vpop.eup %2305 }
 0xaca   :  { %2227 = vmatmul.mubr.msk.f32.vlgmr.msra.gmra.mxu1 %vm34_vm1, %v2306_v40  ;;  %2238 = vmatmul.mubr.msk.f32.vlgmr.msra.gmra.mxu0 %vm34_vm1, %v2306_v40 }
 0xacb   :  { %2241 = vmatpush3.msra.mxu1 %v2547_v55  ;;  %2252 = vmatpush3.msra.mxu0 %v2508_v45 }
 0xacc   :  { %2242 = vmatprep.subr.mxu1 %v2361_v1  ;;  %2253 = vmatprep.subr.mxu0 %v2361_v1 }
 0xacd   :  { %2243 = vmatpush3.msra.mxu1 %v2552_v56  ;;  %2254 = vmatpush3.msra.mxu0 %v2515_v46 }
 0xace   :  { %2244 = vmatprep.subr.mxu1 %v2361_v1  ;;  %2255 = vmatprep.subr.mxu0 %v2361_v1 }
 0xacf   :  { %2245 = vmatpush3.msra.mxu1 %v2559_v57  ;;  %2256 = vmatpush3.msra.mxu0 %v2522_v47 }
 0xad0   :  { %2246 = vmatprep.subr.mxu1 %v2361_v1  ;;  %2257 = vmatprep.subr.mxu0 %v2361_v1 }
 0xad1   :  { %2247 = vmatpush3.msra.mxu1 %v2566_v58  ;;  %2248 = vmatprep.mubr.msk.f32.mxu1 %vm2362_vm0, %v2361_v1 }
 0xad2   :  { %2258 = vmatpush3.msra.mxu0 %v2529_v48  ;;  %2259 = vmatprep.mubr.msk.f32.mxu0 %vm2362_vm0, %v2361_v1 }
 0xad3   :  { %2262 = vmatprep.subr.mxu1 %v2361_v1 }
 0xb46   :  { %v2753_v7 = vpop.xlane.xlu1 %1334 }
 0xb47   :  { %v1336_v9 = vsub.f32 %v2693_v35, %v2753_v7 }
 0xb49   :  { %v1337_v11 = vmul.f32 1.442695, %v1336_v9 }
 0xb8a   :  { %v1499_v41 = vpop.f32.mrf.mxu1  ;;  %v1591_v42 = vpop.f32.mrf.mxu0 }
 0xb8b   :  { %v2719_v43 = vadd.f32 %v2603_v0, %v1499_v41  ;;  %v1596_v44 = vrot.slane %v1591_v42, 6 }
 0xb8c   :  { %v2228_v45 = vpop.f32.mrf.mxu1  ;;  %v2239_v46 = vpop.f32.mrf.mxu0 }
 0xb8d   :  { %v1598_v47 = vadd.f32 %v1596_v44, %v31_v32  ;;  %v1503_v49 = vsel %vm813_vm2, %v2719_v43, -inf }
 0xb8e   :  { %1504 = vmax.xlane.f32.xlu0 %v1503_v49 }
 0xb8f   :  { %2307 = vtanh.f32 %v1598_v47 }
 0xb9c   :  { %v2308_v48 = vpop.eup %2307 }
 0xb9d   :  { %v1601_v50 = vrot.slane %v2308_v48, 2 }
 0xb9f   :  { %2249 = vmatmul.mubr.msk.f32.vlgmr.msra.gmra.mxu1 %vm34_vm1, %v1601_v50  ;;  %2260 = vmatmul.mubr.msk.f32.vlgmr.msra.gmra.mxu0 %vm34_vm1, %v1601_v50 }
 0xba0   :  { %2263 = vmatpush3.msra.mxu1 %v2547_v55  ;;  %2270 = vmatprep.mubr.msk.f32.mxu1 %vm2362_vm0, %v2361_v1 }
 0xba1   :  { %2264 = vmatprep.subr.mxu1 %v2361_v1 }
 0xba2   :  { %2265 = vmatpush3.msra.mxu1 %v2552_v56 }
 0xba3   :  { %2266 = vmatprep.subr.mxu1 %v2361_v1 }
 0xba4   :  { %2267 = vmatpush3.msra.mxu1 %v2559_v57  ;;  %v32_v57 = vld [vmem:[%s2808_s1] sm:$0xff]  ;;  %s2364_s1 = smov [#allocation2]  }
 0xba5   :  { %2268 = vmatprep.subr.mxu1 %v2361_v1  ;;  %s1891_s21 = sshll.u32 %s2364_s1, 4  ;;  %s1892_s21 = int_to_ptr.vmem [resolvable:$true] %s1891_s21 }
 0xba6   :  { %2269 = vmatpush3.msra.mxu1 %v2566_v58  ;;  %s2339_s23 = scalar_lea.vmem %s1892_s21, 16  ;;  %s2343_s24 = scalar_lea.vmem %s1892_s21, 32 }
 0xba7   :  { %p2340_p0 = scmp.ne.s32.totalorder %s1892_s21, %s2339_s23  ;;  %p2344_p1 = scmp.lt.s32.totalorder %s1892_s21, %s1892_s21 }
 0xba8   :  { %p2345_p2 = scmp.lt.s32.totalorder %s2343_s24, %s2339_s23 }
 0xbaa   :  { %p2346_p3 = por %p2345_p2, %p2344_p1 }
 0xbac   :  { %p2347_p4 = pnand %p2346_p3, %p2340_p0 }
 0xc17   :  { %v2757_v10 = vpop.xlane.xlu0 %1504 }
 0xc18   :  { %v1506_v12 = vsub.f32 %v2719_v43, %v2757_v10 }
 0xc1a   :  { %v1507_v13 = vmul.f32 1.442695, %v1506_v12 }
 0xc5f   :  { %v1670_v52 = vpop.f32.mrf.mxu1  ;;  %v1764_v53 = vpop.f32.mrf.mxu0 }
 0xc60   :  { %v2735_v54 = vadd.f32 %v2603_v0, %v1670_v52  ;;  %v1769_v55 = vrot.slane %v1764_v53, 4 }
 0xc61   :  { %v2250_v59 = vpop.f32.mrf.mxu1  ;;  %v2261_v60 = vpop.f32.mrf.mxu0 }
 0xc62   :  { %v1771_v56 = vadd.f32 %v1769_v55, %v31_v32  ;;  %v1674_v61 = vsel %vm813_vm2, %v2735_v54, -inf  ;;  %v998_v55 = vrot.slane %v2634_v14, 6  ;;  %v1687_v14 = vrot.slane %v2735_v54, 6 }
 0xc63   :  { %1675 = vmax.xlane.f32.xlu1 %v1674_v61  ;;  %v1346_v61 = vrot.slane %v2693_v35, 2 }
 0xc64   :  { %2309 = vtanh.f32 %v1771_v56 }
 0xc65   :  { %2311 = vpow2.f32 %v818_v3 }
 0xc66   :  { %2313 = vpow2.f32 %v1163_v8 }
 0xc67   :  { %2315 = vpow2.f32 %v1337_v11 }
 0xc68   :  { %2317 = vpow2.f32 %v1507_v13 }
 0xc71   :  { %v2310_v1 = vpop.eup %2309 }
 0xc72   :  { %v1774_v58 = vrot.slane %v2310_v1, 4  ;;  %v2312_v15 = vpop.eup %2311 }
 0xc73   :  { %v820_v16 = vsel %vm813_vm2, %v2312_v15, 0.0  ;;  %v2314_v17 = vpop.eup %2313 }
 0xc74   :  { %827 = vperm.xlu1 %2279, %v32_v57   ;;  %2271 = vmatmul.mubr.msk.f32.vlgmr.msra.gmra.mxu1 %vm34_vm1, %v1774_v58  ;;  %v1165_v18 = vsel %vm813_vm2, %v2314_v17, 0.0  ;;  %v2316_v19 = vpop.eup %2315 }
 0xc75   :  { %v1339_v20 = vsel %vm813_vm2, %v2316_v19, 0.0  ;;  %v2318_v21 = vpop.eup %2317 }
 0xc76   :  { %v1509_v22 = vsel %vm813_vm2, %v2318_v21, 0.0 }
 0xc98   :  { %821 = vadd.xlane.f32.xlu1 %v820_v16 }
 0xc9c   :  { %1166 = vadd.xlane.f32.xlu1 %v1165_v18 }
 0xca0   :  { %1340 = vadd.xlane.f32.xlu1 %v1339_v20 }
 0xca4   :  { %1510 = vadd.xlane.f32.xlu1 %v1509_v22 }
 0xcec   :  { %v2765_v23 = vpop.xlane.xlu1 %1675 }
 0xced   :  { %v1677_v25 = vsub.f32 %v2735_v54, %v2765_v23 }
 0xcef   :  { %v1678_v26 = vmul.f32 1.442695, %v1677_v25 }
 0xcf0   :  { %v828_v39 = vpop.permute.xlu1 %827 }
 0xcf1   :  { %2319 = vpow2.f32 %v1678_v26  ;;  %vm829_vm3 = vcmp.eq.s32.totalorder %v659_v38, %v828_v39 }
 0xcf2   :  { %2321 = vpow2.f32 %v989_v36  ;;  %v1000_v60 = vsel %vm829_vm3, %v998_v55, 0.0  ;;  %v1348_v57 = vsel %vm829_vm3, %v1346_v61, 0.0 }
 0xcf3   :  { %v1002_v56 = vsel %vm1001_vm6, %v1000_v60, 0.0  ;;  %v1350_v58 = vsel %vm1349_vm7, %v1348_v57, 0.0 }
 0xcfe   :  { %v2320_v27 = vpop.eup %2319 }
 0xcff   :  { %v1680_v28 = vsel %vm813_vm2, %v2320_v27, 0.0  ;;  %v2322_v40 = vpop.eup %2321 }
 0xd00   :  { %1681 = vadd.xlane.f32.xlu1 %v1680_v28  ;;  %v991_v41 = vsel %vm813_vm2, %v2322_v40, 0.0 }
 0xd21   :  { %v822_v5 = vpop.xlane.xlu1 %821 }
 0xd25   :  { %v1167_v8 = vpop.xlane.xlu1 %1166 }
 0xd29   :  { %v1341_v9 = vpop.xlane.xlu1 %1340 }
 0xd2d   :  { %v1511_v35 = vpop.xlane.xlu1 %1510 }
 0xd34   :  { %v1843_v29 = vpop.f32.mrf.mxu1 }
 0xd35   :  { %v1844_v30 = vadd.f32 %v2603_v0, %v1843_v29  ;;  %v1172_v0 = vrot.slane %v2662_v24, 4 }
 0xd36   :  { %v2272_v31 = vpop.f32.mrf.mxu1 }
 0xd37   :  { %v1847_v32 = vsel %vm813_vm2, %v1844_v30, -inf  ;;  %v1174_v42 = vsel %vm829_vm3, %v1172_v0, 0.0  ;;  %v1860_v24 = vrot.slane %v1844_v30, 4 }
 0xd38   :  { %1848 = vmax.xlane.f32.xlu0 %v1847_v32  ;;  %v1176_v44 = vsel %vm1175_vm4, %v1174_v42, 0.0 }
 0xd4e   :  { %1516 = vperm.xlu0 %2280, %v33_v33  }
 0xd6d   :  { %992 = vadd.xlane.f32.xlu0 %v991_v41 }
 0xd71   :  { %1177 = vadd.xlane.f32.xlu0 %v1176_v44 }
 0xd89   :  { %v1682_v11 = vpop.xlane.xlu1 %1681 }
 0xdc1   :  { %v2780_v45 = vpop.xlane.xlu0 %1848 }
 0xdc2   :  { %v1850_v46 = vsub.f32 %v1844_v30, %v2780_v45 }
 0xdc4   :  { %v1851_v47 = vmul.f32 1.442695, %v1850_v46 }
 0xdc6   :  { %2323 = vpow2.f32 %v1851_v47 }
 0xdc7   :  { %2325 = vlog2.f32 %v822_v5 }
 0xdc9   :  { %v1517_v49 = vpop.permute.xlu0 %1516 }
 0xdca   :  { %vm1518_vm5 = vcmp.eq.s32.totalorder %v659_v38, %v1517_v49 }
 0xdcb   :  { %v1519_v48 = vsel %vm1518_vm5, %v2719_v43, 0.0  ;;  %v1862_v51 = vsel %vm1518_vm5, %v1860_v24, 0.0  ;;  %v830_v43 = vsel %vm829_vm3, %v2606_v4, 0.0  ;;  %v1689_v63 = vsel %vm1518_vm5, %v1687_v14, 0.0 }
 0xdcc   :  { %v1520_v50 = vsel %vm813_vm2, %v1519_v48, 0.0  ;;  %v1863_v52 = vsel %vm1175_vm4, %v1862_v51, 0.0  ;;  %v831_v1 = vsel %vm813_vm2, %v830_v43, 0.0  ;;  %v1690_v3 = vsel %vm1001_vm6, %v1689_v63, 0.0 }
 0xdcd   :  { %1521 = vadd.xlane.f32.xlu0 %v1520_v50 }
 0xdd1   :  { %1864 = vadd.xlane.f32.xlu0 %v1863_v52 }
 0xdd3   :  { %v2324_v53 = vpop.eup %2323 }
 0xdd4   :  { %v1853_v59 = vsel %vm813_vm2, %v2324_v53, 0.0  ;;  %v2326_v12 = vpop.eup %2325 }
 0xdd5   :  { %1854 = vadd.xlane.f32.xlu1 %v1853_v59  ;;  %v824_v15 = vmul.f32 0.6931472, %v2326_v12 }
 0xdd7   :  { %v825_v26 = vadd.f32 %v824_v15, %v2743_v62 }
 0xdd9   :  { %1003 = vadd.xlane.f32.xlu1 %v1002_v56 }
 0xddd   :  { %832 = vadd.xlane.f32.xlu1 %v831_v1 }
 0xde1   :  { %1351 = vadd.xlane.f32.xlu1 %v1350_v58 }
 0xde5   :  { %1691 = vadd.xlane.f32.xlu1 %v1690_v3 }
 0xdf6   :  { %v993_v4 = vpop.xlane.xlu0 %992 }
 0xdf7   :  { %2327 = vlog2.f32 %v993_v4 }
 0xdf8   :  { %2329 = vlog2.f32 %v1167_v8 }
 0xdf9   :  { %2331 = vlog2.f32 %v1341_v9 }
 0xdfa   :  { %2333 = vlog2.f32 %v1511_v35  ;;  %v1178_v21 = vpop.xlane.xlu0 %1177 }
 0xdfb   :  { %2335 = vlog2.f32 %v1682_v11  ;;  %v1180_v31 = vrot.slane %v1178_v21, 4 }
 0xe04   :  { %v2328_v54 = vpop.eup %2327 }
 0xe05   :  { %v995_v16 = vmul.f32 0.6931472, %v2328_v54  ;;  %v2330_v17 = vpop.eup %2329 }
 0xe06   :  { %v2332_v20 = vpop.eup %2331  ;;  %v1169_v22 = vmul.f32 0.6931472, %v2330_v17 }
 0xe07   :  { %v996_v25 = vadd.f32 %v995_v16, %v2751_v6  ;;  %v2334_v27 = vpop.eup %2333  ;;  %v1343_v30 = vmul.f32 0.6931472, %v2332_v20 }
 0xe08   :  { %v2336_v29 = vpop.eup %2335  ;;  %v1513_v36 = vmul.f32 0.6931472, %v2334_v27  ;;  %v1170_v37 = vadd.f32 %v1169_v22, %v2747_v2 }
 0xe09   :  { %v1684_v39 = vmul.f32 0.6931472, %v2336_v29  ;;  %v1344_v41 = vadd.f32 %v1343_v30, %v2753_v7 }
 0xe0a   :  { %v1182_v0 = vsub.f32 %v1170_v37, %v1180_v31  ;;  %v1514_v62 = vadd.f32 %v1513_v36, %v2757_v10 }
 0xe0b   :  { %v1685_v48 = vadd.f32 %v1684_v39, %v2765_v23 }
 0xe56   :  { %v1522_v34 = vpop.xlane.xlu0 %1521 }
 0xe57   :  { %v1523_v50 = vsub.f32 %v1514_v62, %v1522_v34 }
 0xe5a   :  { %v1865_v49 = vpop.xlane.xlu0 %1864 }
 0xe5b   :  { %v1867_v53 = vrot.slane %v1865_v49, 4 }
 0xe5e   :  { %v1855_v13 = vpop.xlane.xlu1 %1854 }
 0xe5f   :  { %2337 = vlog2.f32 %v1855_v13 }
 0xe62   :  { %v1004_v18 = vpop.xlane.xlu1 %1003 }
 0xe63   :  { %v1006_v19 = vrot.slane %v1004_v18, 2 }
 0xe65   :  { %v1008_v32 = vsub.f32 %v996_v25, %v1006_v19 }
 0xe66   :  { %v833_v28 = vpop.xlane.xlu1 %832 }
 0xe67   :  { %v834_v33 = vsub.f32 %v825_v26, %v833_v28 }
 0xe69   :  { %v1009_v38 = vadd.f32 %v1008_v32, %v834_v33 }
 0xe6a   :  { %v1352_v40 = vpop.xlane.xlu1 %1351 }
 0xe6b   :  { %v1354_v6 = vrot.slane %v1352_v40, 6  ;;  %v1183_v46 = vadd.f32 %v1182_v0, %v1009_v38 }
 0xe6c   :  { %v2338_v42 = vpop.eup %2337 }
 0xe6d   :  { %v1857_v44 = vmul.f32 0.6931472, %v2338_v42  ;;  %v1356_v47 = vsub.f32 %v1344_v41, %v1354_v6 }
 0xe6e   :  { %v1692_v24 = vpop.xlane.xlu1 %1691 }
 0xe6f   :  { %v1858_v2 = vadd.f32 %v1857_v44, %v2780_v45  ;;  %v1357_v51 = vadd.f32 %v1356_v47, %v1183_v46  ;;  %v1694_v52 = vrot.slane %v1692_v24, 2 }
 0xe71   :  { %v1696_v55 = vsub.f32 %v1685_v48, %v1694_v52  ;;  %v1524_v59 = vadd.f32 %v1523_v50, %v1357_v51  ;;  %v1869_v60 = vsub.f32 %v1858_v2, %v1867_v53 }
 0xe73   :  { %v1697_v7 = vadd.f32 %v1696_v55, %v1524_v59 }
 0xe75   :  { %v1870_v56 = vadd.f32 %v1869_v60, %v1697_v7 }
 0xe77   :  { %v1872_v10 = vsel %vm1871_vm8, %v1870_v56, 0.0 }
 0xe78   :  { %1873 = vadd.xlane.f32.xlu1 %v1872_v10 }
 0xf01   :  { %v1874_v43 = vpop.xlane.xlu1 %1873 }
 0xf02   :  { %v1875_v61 = vrot.slane %v1874_v43, 4 }
 0xf04   :  { %v1876_v1 = vadd.f32 %v1875_v61, %v1874_v43 }
 0xf06   :  { %v1877_v57 = vrot.slane %v1876_v1, 2 }
 0xf08   :  { %v1878_v23 = vadd.f32 %v1877_v57, %v1876_v1 }
 0xf0a   :  { %v1879_v14 = vrot.slane %v1878_v23, 1 }
 0xf0c   :  { %v1880_v58 = vadd.f32 %v1879_v14, %v1878_v23 }
 0xf0e   :  { %2273 = vpush %v1880_v58 }
 0xf3f   :  { %s2274_s22 = spop %2273 }
 0xf40   :  { %v1882_v45 = vstv %s2274_s22 }
 0xf41   :  { %1884 = vst.msk [vmem:[#allocation2] sm:$0x1] %vm1883_vm9, %v1882_v45 }
 0xf42   :  { %2350 = shalt.err (!%p2347_p4)
}
 0xf43   :  { %1894 = dma.vmem_to_hbm [thread:$0]  %s1892_s21, 16, %s2810_s3, [#allocation3]  }
 0xf44   :  { %2359 = dma.done.wait [#allocation3], 16  }
 0xf45   :  { %2360 = vsyncadd [#allocation3], 4294967280 }
 0xf46   :  { %1898 = vsyncpa [#allocation3], 1 }

</bundles_post_ra>
